<compile_context>
chip_gen: v7x
topology: tpu7x:2x2x1
jax: 0.10.0
libtpu: 0.0.40
codegen_flags: <defaults>
</compile_context>

<pallas_src>
import jax
import jax.numpy as jnp
from jax.experimental import pallas as pl
from jax.experimental.pallas import tpu as pltpu

_LANE = 128


def _round_up(x, m):
    return (x + m - 1) // m * m


def _pick_batch_tile(B):
    # Prefer MXU-friendly tiles capped at 256; prefer >=2 grid steps (megacore)
    # when possible; otherwise the largest divisor from the candidate list.
    for tb in (256, 128, 64, 32, 16, 8):
        if B % tb == 0 and B // tb >= 2:
            return tb
    for tb in (256, 128, 64, 32, 16, 8):
        if B % tb == 0:
            return tb
    return B


def brain_kernel(x_ref, w1_ref, b1_ref, w2_ref, b2_ref, w3_ref, b3_ref, o_ref):
    # MXU inputs in bf16, f32 accumulation; bias-add + ReLU stay f32 (VPU).
    x = x_ref[...].astype(jnp.bfloat16)
    h1 = jnp.dot(x, w1_ref[...], preferred_element_type=jnp.float32)
    h1 = jnp.maximum(h1 + b1_ref[...], 0.0)

    h2 = jnp.dot(h1.astype(jnp.bfloat16), w2_ref[...],
                 preferred_element_type=jnp.float32)
    h2 = jnp.maximum(h2 + b2_ref[...], 0.0)

    out = jnp.dot(h2.astype(jnp.bfloat16), w3_ref[...],
                  preferred_element_type=jnp.float32)
    o_ref[...] = (out + b3_ref[...]).astype(o_ref.dtype)


def brain_forward(x, params, *, batch_tile=None):
    """Brain forward pass as one fused Pallas TPU kernel.

    x: [B, n_obs] float32
    params: dict with w1 [n_obs, H], b1 [1, H], w2 [H, H], b2 [1, H],
            w3 [H, A], b3 [1, A]   (weights already transposed vs torch)
    """
    w1, b1, w2, b2, w3, b3 = (params[k] for k in ("w1", "b1", "w2", "b2", "w3", "b3"))
    B, n_obs = x.shape
    H = w1.shape[1]
    A = w3.shape[1]

    tb = batch_tile or _pick_batch_tile(B)
    assert B % tb == 0, f"batch {B} must be divisible by batch tile {tb}"

    # Lane-dense output: pad the final layer's output width up to a multiple of
    # 128 so the output tile writeback is unmasked/full-lane; slice after.
    A_pad = max(_round_up(A, _LANE), _LANE)
    if A_pad != A:
        w3 = jnp.pad(w3, ((0, 0), (0, A_pad - A)))
        b3 = jnp.pad(b3, ((0, 0), (0, A_pad - A)))

    # bf16 MXU operands (accumulation stays f32 inside the kernel).
    w1 = w1.astype(jnp.bfloat16)
    w2 = w2.astype(jnp.bfloat16)
    w3 = w3.astype(jnp.bfloat16)

    grid = (B // tb,)
    rep = lambda i: (0, 0)  # weights/biases resident across the batch grid

    flops = 2 * B * (n_obs * H + H * H + H * A_pad)
    bytes_accessed = (
        B * n_obs * 4                      # x (f32 in)
        + (n_obs * H + H * H + H * A_pad) * 2  # bf16 weights
        + (2 * H + A_pad) * 4              # f32 biases
        + B * A_pad * 4                    # f32 out
    )

    out_padded = pl.pallas_call(
        brain_kernel,
        out_shape=jax.ShapeDtypeStruct((B, A_pad), jnp.float32),
        grid_spec=pl.GridSpec(
            grid=grid,
            in_specs=[
                pl.BlockSpec((tb, n_obs), lambda i: (i, 0)),   # x tile
                pl.BlockSpec((n_obs, H), rep),                 # w1
                pl.BlockSpec((1, H), rep),                     # b1
                pl.BlockSpec((H, H), rep),                     # w2
                pl.BlockSpec((1, H), rep),                     # b2
                pl.BlockSpec((H, A_pad), rep),                 # w3 (padded)
                pl.BlockSpec((1, A_pad), rep),                 # b3 (padded)
            ],
            out_specs=pl.BlockSpec((tb, A_pad), lambda i: (i, 0)),
        ),
        compiler_params=pltpu.CompilerParams(
            dimension_semantics=("parallel",),
        ),
        cost_estimate=pl.CostEstimate(
            flops=flops, transcendentals=0, bytes_accessed=bytes_accessed),
    )(x, w1, b1, w2, b2, w3, b3)

    return out_padded[:, :A]


def init_brain_params(key, n_observations, n_actions=4, layer_size=128):
    """Deterministic parameter init (uniform, torch-Linear-like bounds)."""
    ks = jax.random.split(key, 6)

    def linear(kw, kb, fan_in, fan_out):
        bound = 1.0 / jnp.sqrt(fan_in)
        w = jax.random.uniform(kw, (fan_in, fan_out), jnp.float32, -bound, bound)
        b = jax.random.uniform(kb, (1, fan_out), jnp.float32, -bound, bound)
        return w, b

    w1, b1 = linear(ks[0], ks[1], n_observations, layer_size)
    w2, b2 = linear(ks[2], ks[3], layer_size, layer_size)
    w3, b3 = linear(ks[4], ks[5], layer_size, n_actions)
    return {"w1": w1, "b1": b1, "w2": w2, "b2": b2, "w3": w3, "b3": b3}


def brain_forward_ref(x, p):
    """Pure-JAX fp32 reference (matches the torch module semantics)."""
    h1 = jnp.maximum(x @ p["w1"] + p["b1"], 0.0)
    h2 = jnp.maximum(h1 @ p["w2"] + p["b2"], 0.0)
    return h2 @ p["w3"] + p["b3"]


if __name__ == "__main__":
    key = jax.random.PRNGKey(0)
    k_param, k_x = jax.random.split(key)

    batch = 8
    n_observations = 32
    n_actions = 4
    layer_size = 128

    params = init_brain_params(k_param, n_observations, n_actions, layer_size)
    x = jax.random.normal(k_x, (batch, n_observations), dtype=jnp.float32)

    fwd = jax.jit(brain_forward)
    out = jax.block_until_ready(fwd(x, params))

    ref = brain_forward_ref(x, params)
    assert out.shape == (batch, n_actions)
    # bf16 MXU inputs with f32 accumulation: allow ~1% deviation vs fp32 ref.
    assert jnp.allclose(out, ref, atol=5e-2, rtol=5e-2), "mismatch vs JAX reference"

    print("KERNEL_OK")
</pallas_src>

<mosaic_0001>
module attributes {stable_mosaic.version = 11 : i64} {
  func.func @brain_kernel(%arg0: i32, %arg1: memref<8x32xf32, #tpu.memory_space<vmem>>, %arg2: memref<32x128xbf16, #tpu.memory_space<vmem>>, %arg3: memref<1x128xf32, #tpu.memory_space<vmem>>, %arg4: memref<128x128xbf16, #tpu.memory_space<vmem>>, %arg5: memref<1x128xf32, #tpu.memory_space<vmem>>, %arg6: memref<128x128xbf16, #tpu.memory_space<vmem>>, %arg7: memref<1x128xf32, #tpu.memory_space<vmem>>, %arg8: memref<8x128xf32, #tpu.memory_space<vmem>>) attributes {dimension_semantics = [#tpu.dimension_semantics<parallel>], iteration_bounds = array<i64: 1>, scalar_prefetch = 0 : i64, scratch_operands = 0 : i64, tpu.core_type = #tpu.core_type<tc>, window_params = [{transform_indices = @transform_0, window_bounds = array<i64: 8, 32>}, {pipeline_mode = #tpu.pipeline_mode<synchronous>, transform_indices = @transform_1, window_bounds = array<i64: 32, 128>}, {pipeline_mode = #tpu.pipeline_mode<synchronous>, transform_indices = @transform_2, window_bounds = array<i64: 1, 128>}, {pipeline_mode = #tpu.pipeline_mode<synchronous>, transform_indices = @transform_3, window_bounds = array<i64: 128, 128>}, {pipeline_mode = #tpu.pipeline_mode<synchronous>, transform_indices = @transform_4, window_bounds = array<i64: 1, 128>}, {pipeline_mode = #tpu.pipeline_mode<synchronous>, transform_indices = @transform_5, window_bounds = array<i64: 128, 128>}, {pipeline_mode = #tpu.pipeline_mode<synchronous>, transform_indices = @transform_6, window_bounds = array<i64: 1, 128>}, {transform_indices = @transform_7, window_bounds = array<i64: 8, 128>}]} {
    %c0 = arith.constant 0 : index
    %c0_0 = arith.constant 0 : index
    %0 = vector.load %arg1[%c0, %c0_0] : memref<8x32xf32, #tpu.memory_space<vmem>>, vector<8x32xf32>
    %1 = arith.truncf %0 : vector<8x32xf32> to vector<8x32xbf16>
    %c0_1 = arith.constant 0 : index
    %c0_2 = arith.constant 0 : index
    %2 = vector.load %arg2[%c0_1, %c0_2] : memref<32x128xbf16, #tpu.memory_space<vmem>>, vector<32x128xbf16>
    %cst = arith.constant dense<0.000000e+00> : vector<8x128xf32>
    %3 = tpu.matmul %1, %2, %cst {dimension_numbers = #tpu.dot_dimension_numbers<[1], [0], [0], [1], [0, 0, 1, 1], [], []>} : vector<8x32xbf16>, vector<32x128xbf16>, vector<8x128xf32> -> vector<8x128xf32>
    %c0_3 = arith.constant 0 : index
    %c0_4 = arith.constant 0 : index
    %4 = vector.load %arg3[%c0_3, %c0_4] : memref<1x128xf32, #tpu.memory_space<vmem>>, vector<1x128xf32>
    %5 = vector.broadcast %4 : vector<1x128xf32> to vector<8x128xf32>
    %6 = arith.addf %3, %5 : vector<8x128xf32>
    %cst_5 = arith.constant 0.000000e+00 : f32
    %7 = vector.broadcast %cst_5 : f32 to vector<8x128xf32>
    %8 = arith.maximumf %6, %7 : vector<8x128xf32>
    %9 = arith.truncf %8 : vector<8x128xf32> to vector<8x128xbf16>
    %c0_6 = arith.constant 0 : index
    %c0_7 = arith.constant 0 : index
    %10 = vector.load %arg4[%c0_6, %c0_7] : memref<128x128xbf16, #tpu.memory_space<vmem>>, vector<128x128xbf16>
    %cst_8 = arith.constant dense<0.000000e+00> : vector<8x128xf32>
    %11 = tpu.matmul %9, %10, %cst_8 {dimension_numbers = #tpu.dot_dimension_numbers<[1], [0], [0], [1], [0, 0, 1, 1], [], []>} : vector<8x128xbf16>, vector<128x128xbf16>, vector<8x128xf32> -> vector<8x128xf32>
    %c0_9 = arith.constant 0 : index
    %c0_10 = arith.constant 0 : index
    %12 = vector.load %arg5[%c0_9, %c0_10] : memref<1x128xf32, #tpu.memory_space<vmem>>, vector<1x128xf32>
    %13 = vector.broadcast %12 : vector<1x128xf32> to vector<8x128xf32>
    %14 = arith.addf %11, %13 : vector<8x128xf32>
    %cst_11 = arith.constant 0.000000e+00 : f32
    %15 = vector.broadcast %cst_11 : f32 to vector<8x128xf32>
    %16 = arith.maximumf %14, %15 : vector<8x128xf32>
    %17 = arith.truncf %16 : vector<8x128xf32> to vector<8x128xbf16>
    %c0_12 = arith.constant 0 : index
    %c0_13 = arith.constant 0 : index
    %18 = vector.load %arg6[%c0_12, %c0_13] : memref<128x128xbf16, #tpu.memory_space<vmem>>, vector<128x128xbf16>
    %cst_14 = arith.constant dense<0.000000e+00> : vector<8x128xf32>
    %19 = tpu.matmul %17, %18, %cst_14 {dimension_numbers = #tpu.dot_dimension_numbers<[1], [0], [0], [1], [0, 0, 1, 1], [], []>} : vector<8x128xbf16>, vector<128x128xbf16>, vector<8x128xf32> -> vector<8x128xf32>
    %c0_15 = arith.constant 0 : index
    %c0_16 = arith.constant 0 : index
    %20 = vector.load %arg7[%c0_15, %c0_16] : memref<1x128xf32, #tpu.memory_space<vmem>>, vector<1x128xf32>
    %21 = vector.broadcast %20 : vector<1x128xf32> to vector<8x128xf32>
    %22 = arith.addf %19, %21 : vector<8x128xf32>
    %c0_17 = arith.constant 0 : index
    %c0_18 = arith.constant 0 : index
    %23 = vector.load %arg8[%c0_17, %c0_18] : memref<8x128xf32, #tpu.memory_space<vmem>>, vector<8x128xf32>
    tpu.vector_store %arg8[%c0_17, %c0_18], %22 {strides = array<i32>} : memref<8x128xf32, #tpu.memory_space<vmem>>, vector<8x128xf32>,
    return
  }
  func.func @transform_0(%arg0: i32) -> (i32, i32) {
    %c0_i32 = arith.constant 0 : i32
    %c0_i32_0 = arith.constant 0 : i32
    return %arg0, %c0_i32 : i32, i32
  }
  func.func @transform_1(%arg0: i32) -> (i32, i32) {
    %c0_i32 = arith.constant 0 : i32
    %c0_i32_0 = arith.constant 0 : i32
    %c0_i32_1 = arith.constant 0 : i32
    return %c0_i32, %c0_i32_0 : i32, i32
  }
  func.func @transform_2(%arg0: i32) -> (i32, i32) {
    %c0_i32 = arith.constant 0 : i32
    %c0_i32_0 = arith.constant 0 : i32
    %c0_i32_1 = arith.constant 0 : i32
    return %c0_i32, %c0_i32_0 : i32, i32
  }
  func.func @transform_3(%arg0: i32) -> (i32, i32) {
    %c0_i32 = arith.constant 0 : i32
    %c0_i32_0 = arith.constant 0 : i32
    %c0_i32_1 = arith.constant 0 : i32
    return %c0_i32, %c0_i32_0 : i32, i32
  }
  func.func @transform_4(%arg0: i32) -> (i32, i32) {
    %c0_i32 = arith.constant 0 : i32
    %c0_i32_0 = arith.constant 0 : i32
    %c0_i32_1 = arith.constant 0 : i32
    return %c0_i32, %c0_i32_0 : i32, i32
  }
  func.func @transform_5(%arg0: i32) -> (i32, i32) {
    %c0_i32 = arith.constant 0 : i32
    %c0_i32_0 = arith.constant 0 : i32
    %c0_i32_1 = arith.constant 0 : i32
    return %c0_i32, %c0_i32_0 : i32, i32
  }
  func.func @transform_6(%arg0: i32) -> (i32, i32) {
    %c0_i32 = arith.constant 0 : i32
    %c0_i32_0 = arith.constant 0 : i32
    %c0_i32_1 = arith.constant 0 : i32
    return %c0_i32, %c0_i32_0 : i32, i32
  }
  func.func @transform_7(%arg0: i32) -> (i32, i32) {
    %c0_i32 = arith.constant 0 : i32
    %c0_i32_0 = arith.constant 0 : i32
    return %arg0, %c0_i32 : i32, i32
  }
}

</mosaic_0001>

<bundles_post_ra>
// kernel: brain_forward.1
= control target key start
LH: loop header
LB: loop body
LE: loop exit
PB: predicated region body
PF: predicated region fallthrough
CT: control target
= control target key end

     0   :  { %v438_v0 = vmov 0.0   ;;  %vm439_vm0 = vmmov 0   ;;  %vm52_vm1 = vcmask 261120   ;;  %s573_s1 = inlined_call_operand.vmem [shape: bf16[32,128], index: 1, kind: input, shape index: {}]   ;;  %s574_s0 = inlined_call_operand.vmem [shape: f32[8,32], index: 0, kind: input, shape index: {}]   ;;  %s575_s3 = inlined_call_operand.vmem [shape: bf16[128,128], index: 3, kind: input, shape index: {}]   ;;  %s576_s5 = inlined_call_operand.vmem [shape: bf16[128,128], index: 5, kind: input, shape index: {}]   ;;  %s577_s2 = inlined_call_operand.vmem [shape: f32[1,128], index: 2, kind: input, shape index: {}]   ;;  %s578_s4 = inlined_call_operand.vmem [shape: f32[1,128], index: 4, kind: input, shape index: {}]   ;;  %s579_s6 = inlined_call_operand.vmem [shape: f32[1,128], index: 6, kind: input, shape index: {}]   ;;  %s580_s7 = inlined_call_operand.vmem [shape: f32[8,128], index: 7, kind: output, shape index: {}]  }
   0x1   :  { %370 = vmatprep.subr.bf16.mxu0 %v438_v0  ;;  %v420_v1 = vld [vmem:[%s573_s1] sm:$0xff]   ;;  %374 = vmatprep.mubr.msk.bf16.mxu0 %vm439_vm0, %v438_v0  ;;  %v421_v2 = vld [vmem:[%s573_s1 + $0x8] sm:$0xff]   ;;  %v424_v7 = vld [vmem:[%s575_s3 + $0x10] sm:$0xff]  }
   0x2   :  { %378 = vmatprep.subr.bf16.mxu1 %v438_v0  ;;  %394 = vmatprep.mubr.msk.bf16.mxu1 %vm439_vm0, %v438_v0  ;;  %v27_v3 = vld [vmem:[%s574_s0] sm:$0xff]  ;;  %v423_v6 = vld [vmem:[%s575_s3 + $0x8] sm:$0xff]   ;;  %v425_v8 = vld [vmem:[%s575_s3 + $0x18] sm:$0xff]  }
   0x3   :  { %371 = vmatpush3.bf16.msra.mxu0 %v420_v1  ;;  %v422_v4 = vld [vmem:[%s575_s3] sm:$0xff]   ;;  %v28_v5 = vpack.c.bf16 %v27_v3, %v27_v3  ;;  %v427_v10 = vld [vmem:[%s575_s3 + $0x28] sm:$0xff]   ;;  %v428_v11 = vld [vmem:[%s575_s3 + $0x30] sm:$0xff]  }
   0x4   :  { %372 = vmatprep.subr.bf16.mxu0 %v438_v0  ;;  %379 = vmatpush3.bf16.msra.mxu1 %v422_v4  ;;  %v426_v9 = vld [vmem:[%s575_s3 + $0x20] sm:$0xff]   ;;  %v429_v12 = vld [vmem:[%s575_s3 + $0x38] sm:$0xff]   ;;  %v431_v14 = vld [vmem:[%s576_s5 + $0x8] sm:$0xff]  }
   0x5   :  { %380 = vmatprep.subr.bf16.mxu1 %v438_v0  ;;  %v430_v13 = vld [vmem:[%s576_s5] sm:$0xff]   ;;  %v432_v15 = vld [vmem:[%s576_s5 + $0x10] sm:$0xff]   ;;  %v433_v16 = vld [vmem:[%s576_s5 + $0x18] sm:$0xff]  }
   0x6   :  { %v434_v17 = vld [vmem:[%s576_s5 + $0x20] sm:$0xff]   ;;  %v435_v18 = vld [vmem:[%s576_s5 + $0x28] sm:$0xff]   ;;  %v436_v27 = vld [vmem:[%s576_s5 + $0x30] sm:$0xff]  }
   0x7   :  { %373 = vmatpush3.bf16.msra.mxu0 %v421_v2  ;;  %v327_v19 = vld [vmem:[%s577_s2] ss:$0 sm:$0xff]  ;;  %v437_v28 = vld [vmem:[%s576_s5 + $0x38] sm:$0xff]  }
   0x8   :  { %398 = vmatprep.subr.bf16.mxu0 %v438_v0  ;;  %381 = vmatpush3.bf16.msra.mxu1 %v423_v6  ;;  %v331_v29 = vld [vmem:[%s578_s4] ss:$0 sm:$0xff] }
   0x9   :  { %382 = vmatprep.subr.bf16.mxu1 %v438_v0  ;;  %v340_v37 = vld [vmem:[%s579_s6] ss:$0 sm:$0xff] }
   0xa   :  { %375 = vmatmul.mubr.msk.bf16.vlgmr.msra.gmra.mrb[0].mxu0 %vm52_vm1, %v28_v5 }
   0xb   :  { %414 = vmatprep.mubr.msk.bf16.mxu0 %vm439_vm0, %v438_v0  ;;  %399 = vmatpush3.bf16.msra.mxu0 %v430_v13 }
   0xc   :  { %383 = vmatpush3.bf16.msra.mxu1 %v424_v7  ;;  %400 = vmatprep.subr.bf16.mxu0 %v438_v0 }
   0xd   :  { %384 = vmatprep.subr.bf16.mxu1 %v438_v0 }
   0xf   :  { %401 = vmatpush3.bf16.msra.mxu0 %v431_v14 }
  0x10   :  { %385 = vmatpush3.bf16.msra.mxu1 %v425_v8  ;;  %402 = vmatprep.subr.bf16.mxu0 %v438_v0 }
  0x11   :  { %386 = vmatprep.subr.bf16.mxu1 %v438_v0 }
  0x13   :  { %403 = vmatpush3.bf16.msra.mxu0 %v432_v15 }
  0x14   :  { %387 = vmatpush3.bf16.msra.mxu1 %v426_v9  ;;  %404 = vmatprep.subr.bf16.mxu0 %v438_v0 }
  0x15   :  { %388 = vmatprep.subr.bf16.mxu1 %v438_v0 }
  0x17   :  { %405 = vmatpush3.bf16.msra.mxu0 %v433_v16 }
  0x18   :  { %389 = vmatpush3.bf16.msra.mxu1 %v427_v10  ;;  %406 = vmatprep.subr.bf16.mxu0 %v438_v0 }
  0x19   :  { %390 = vmatprep.subr.bf16.mxu1 %v438_v0 }
  0x1b   :  { %407 = vmatpush3.bf16.msra.mxu0 %v434_v17 }
  0x1c   :  { %391 = vmatpush3.bf16.msra.mxu1 %v428_v11  ;;  %408 = vmatprep.subr.bf16.mxu0 %v438_v0 }
  0x1d   :  { %392 = vmatprep.subr.bf16.mxu1 %v438_v0 }
  0x1f   :  { %409 = vmatpush3.bf16.msra.mxu0 %v435_v18 }
  0x20   :  { %393 = vmatpush3.bf16.msra.mxu1 %v429_v12  ;;  %410 = vmatprep.subr.bf16.mxu0 %v438_v0 }
  0x23   :  { %411 = vmatpush3.bf16.msra.mxu0 %v436_v27 }
  0x24   :  { %412 = vmatprep.subr.bf16.mxu0 %v438_v0 }
  0x27   :  { %413 = vmatpush3.bf16.msra.mxu0 %v437_v28 }
  0xdd   :  { %v90_v20 = vpop.f32.mrb[0].mxu0 }
  0xde   :  { %v91_v21 = vadd.f32 %v327_v19, %v90_v20  ;;  %v376_v22 = vpop.f32.mrb[1].mxu0 }
  0xdf   :  { %v93_v23 = vpop.f32.mrb[2].mxu0 }
  0xe0   :  { %v96_v24 = vmax.f32 %v91_v21, 0.0  ;;  %v377_v25 = vpop.f32.mrb[3].mxu0 }
  0xe2   :  { %v97_v26 = vpack.c.bf16 %v96_v24, %v96_v24 }
  0xe4   :  { %395 = vmatmul.mubr.bf16.vlgmr.msra.gmra.mrb[0].mxu1 %v97_v26 }
 0x1b7   :  { %v203_v30 = vpop.f32.mrb[0].mxu1 }
 0x1b8   :  { %v204_v31 = vadd.f32 %v331_v29, %v203_v30  ;;  %v396_v32 = vpop.f32.mrb[1].mxu1 }
 0x1b9   :  { %v206_v33 = vpop.f32.mrb[2].mxu1 }
 0x1ba   :  { %v209_v34 = vmax.f32 %v204_v31, 0.0  ;;  %v397_v35 = vpop.f32.mrb[3].mxu1 }
 0x1bc   :  { %v210_v36 = vpack.c.bf16 %v209_v34, %v209_v34 }
 0x1be   :  { %415 = vmatmul.mubr.bf16.vlgmr.msra.gmra.mrb[4].mxu0 %v210_v36 }
 0x291   :  { %v316_v38 = vpop.f32.mrb[4].mxu0 }
 0x292   :  { %v317_v39 = vadd.f32 %v340_v37, %v316_v38  ;;  %v416_v40 = vpop.f32.mrb[5].mxu0 }
 0x293   :  { %v319_v41 = vpop.f32.mrb[6].mxu0 }
 0x294   :  { %322 = vst [vmem:[%s580_s7] sm:$0xff] %v317_v39  ;;  %v417_v42 = vpop.f32.mrb[7].mxu0 }

</bundles_post_ra>
